<compile_context>
chip_gen: v7x
topology: tpu7x:2x2x1
jax: 0.10.0
libtpu: 0.0.40
codegen_flags: <defaults>
</compile_context>

<pallas_src>
import functools
import math

import numpy as np
import jax
import jax.numpy as jnp
from jax.experimental import pallas as pl
from jax.experimental.pallas import tpu as pltpu


def _cam_grid_kernel(invk_ref, xy1_ref, uv_ref, *, width, row_tile, flat):
    """One (row-tile, batch) grid step.

    invk_ref: (B*9,) f32 SMEM   row-major flattened inverse intrinsics
    xy1_ref : flat: (1, 3, row_tile*width)  else (1, 3, row_tile, width)
    uv_ref  : flat: (2, row_tile*width)     else (2, row_tile, width)
              uv is batch-invariant: written only on the first (b == 0) visit;
              the revisited output block stays resident across the inner batch
              axis and is flushed to HBM once per row-tile.
    """
    r = pl.program_id(0)                       # row-tile index  (outer, parallel)
    b = pl.program_id(1)                       # batch index     (inner, arbitrary)
    row0 = (r * row_tile).astype(jnp.float32)  # first image row of this tile

    if flat:
        n = row_tile * width
        local = jax.lax.broadcasted_iota(jnp.int32, (1, n), 1)
        if (width & (width - 1)) == 0:         # power-of-two width: shift / mask
            shift = width.bit_length() - 1
            u = (local & (width - 1)).astype(jnp.float32)
            v = (local >> shift).astype(jnp.float32) + row0
        else:                                  # general width: exact f32 div+floor
            # local < row_tile*width (budget-capped << 2^23) so this is exact.
            lf = local.astype(jnp.float32)
            v_loc = jnp.floor((lf + 0.5) / float(width))
            u = lf - v_loc * float(width)
            v = v_loc + row0
    else:
        u = jax.lax.broadcasted_iota(jnp.int32, (row_tile, width), 1).astype(jnp.float32)
        v = jax.lax.broadcasted_iota(jnp.int32, (row_tile, width), 0).astype(jnp.float32) + row0

    # Inverse-intrinsics scalars straight out of 1-D SMEM (read once per step).
    base = b * 9
    k00 = invk_ref[base + 0]; k01 = invk_ref[base + 1]; k02 = invk_ref[base + 2]
    k10 = invk_ref[base + 3]; k11 = invk_ref[base + 4]; k12 = invk_ref[base + 5]
    k20 = invk_ref[base + 6]; k21 = invk_ref[base + 7]; k22 = invk_ref[base + 8]

    # xy1 = invK @ [u, v, 1] : nine VPU multiply-adds per lane, no MXU.
    x0 = k00 * u + k01 * v + k02
    x1 = k10 * u + k11 * v + k12
    x2 = k20 * u + k21 * v + k22

    if flat:
        xy1_ref[0, 0:1, :] = x0.astype(xy1_ref.dtype)
        xy1_ref[0, 1:2, :] = x1.astype(xy1_ref.dtype)
        xy1_ref[0, 2:3, :] = x2.astype(xy1_ref.dtype)

        @pl.when(b == 0)
        def _():
            uv_ref[0:1, :] = u
            uv_ref[1:2, :] = v
    else:
        xy1_ref[0, 0, :, :] = x0.astype(xy1_ref.dtype)
        xy1_ref[0, 1, :, :] = x1.astype(xy1_ref.dtype)
        xy1_ref[0, 2, :, :] = x2.astype(xy1_ref.dtype)

        @pl.when(b == 0)
        def _():
            uv_ref[0, :, :] = u
            uv_ref[1, :, :] = v


def _choose_row_tile(height, width, unit, block_bytes_budget=2 << 20,
                     target_row_tiles=4):
    """Row-tile choice: a multiple of `unit` (lane/sublane alignment), capped so
    (a) the widest per-step output block (3 f32 planes) stays <= ~2 MiB — well
        under v7x's 64 MiB VMEM / 32 MiB scoped limit with double buffering —
    (b) there are >= `target_row_tiles` steps along the parallel row axis when
        H allows (v7x megacore + writeback/compute overlap)."""
    H, W = int(height), int(width)
    if H <= unit:
        return H                                   # single full-plane tile
    bytes_per_row = 3 * W * 4
    budget_rows = max(unit, (block_bytes_budget // bytes_per_row) // unit * unit)
    target_rows = ((H + target_row_tiles - 1) // target_row_tiles + unit - 1) // unit * unit
    th = max(unit, min(budget_rows, target_rows))
    return min(th, H)


def cam_grid_pallas(inv_K, height, width, row_tile=None, xy1_dtype=jnp.float32):
    """inv_K: (B, 3, 3) f32.

    Returns:
      xy1_grid     : (B, 3, H, W) xy1_dtype  (inv_K @ [u, v, 1])
      uv_grid_base : (2, H, W)    f32        shared (u, v) pixel grid (written
                                             once, batch-invariant)
    """
    B = int(inv_K.shape[0])
    H, W = int(height), int(width)

    # Lane-dense layout selection: W already a multiple of 128 -> dense NCHW
    # blocks; otherwise flatten H*W so the block's last dim is a 128-multiple.
    flat = (W % 128) != 0
    unit = (128 // math.gcd(W, 128)) if flat else 8

    if row_tile is None:
        row_tile = _choose_row_tile(H, W, unit)
    row_tile = int(row_tile)
    if row_tile < H:                               # sanitize forced tiles
        row_tile = min(H, ((row_tile + unit - 1) // unit) * unit)
    row_tile = min(row_tile, H)

    R = int(pl.cdiv(H, row_tile))                  # ragged last tile is masked
    grid = (R, B)                                  # b innermost -> uv block revisited

    if flat:
        n_flat = H * W
        tile_flat = row_tile * W
        out_shape = (jax.ShapeDtypeStruct((B, 3, n_flat), xy1_dtype),
                     jax.ShapeDtypeStruct((2, n_flat), jnp.float32))
        out_specs = [pl.BlockSpec((1, 3, tile_flat), lambda r, b: (b, 0, r)),
                     pl.BlockSpec((2, tile_flat), lambda r, b: (0, r))]
    else:
        out_shape = (jax.ShapeDtypeStruct((B, 3, H, W), xy1_dtype),
                     jax.ShapeDtypeStruct((2, H, W), jnp.float32))
        out_specs = [pl.BlockSpec((1, 3, row_tile, W), lambda r, b: (b, 0, r, 0)),
                     pl.BlockSpec((2, row_tile, W), lambda r, b: (0, r, 0))]

    kernel = functools.partial(_cam_grid_kernel,
                               width=W, row_tile=row_tile, flat=flat)
    invk_flat = inv_K.astype(jnp.float32).reshape(B * 9)   # 1-D SMEM: no row padding

    xy1, uv = pl.pallas_call(
        kernel,
        out_shape=out_shape,
        grid_spec=pltpu.PrefetchScalarGridSpec(
            num_scalar_prefetch=0,
            grid=grid,
            in_specs=[
                # Whole inverse-K table resident in SMEM: no per-step DMA.
                pl.BlockSpec(memory_space=pltpu.MemorySpace.SMEM),
            ],
            out_specs=out_specs,
        ),
        compiler_params=pltpu.CompilerParams(
            # r: parallel (megacore);  b: arbitrary (uv output revisited over b).
            dimension_semantics=("parallel", "arbitrary"),
            vmem_limit_bytes=32 * 1024 * 1024,
        ),
    )(invk_flat)

    if flat:
        xy1 = xy1.reshape(B, 3, H, W)              # free: same row-major bytes
        uv = uv.reshape(2, H, W)
    return xy1, uv


def _inv_3x3(K):
    """Closed-form (adjugate) inverse of a batch of 3x3 matrices, f32 glue."""
    a, b, c = K[..., 0, 0], K[..., 0, 1], K[..., 0, 2]
    d, e, f = K[..., 1, 0], K[..., 1, 1], K[..., 1, 2]
    g, h, i = K[..., 2, 0], K[..., 2, 1], K[..., 2, 2]
    A = e * i - f * h
    B_ = -(d * i - f * g)
    C = d * h - e * g
    det = a * A + b * B_ + c * C
    adj = jnp.stack([
        jnp.stack([A, -(b * i - c * h), (b * f - c * e)], axis=-1),
        jnp.stack([B_, (a * i - c * g), -(a * f - c * d)], axis=-1),
        jnp.stack([C, -(a * h - b * g), (a * e - b * d)], axis=-1),
    ], axis=-2)
    return adj / det[..., None, None]


def gen_uv1_grid(width, height):
    """(3, H, W): rows are u (pixel x), v (pixel y), 1.  Used for reference."""
    u, v = jnp.meshgrid(jnp.arange(width, dtype=jnp.float32),
                        jnp.arange(height, dtype=jnp.float32), indexing="xy")
    return jnp.stack([u, v, jnp.ones_like(u)], axis=0)


def cam_info_from_K_batched(width, height, K_batched, P_cam_li_batched=None,
                            xy1_dtype=jnp.float32):
    """JAX/Pallas equivalent of CamInfo_from_K_batched (returns a dict)."""
    K_f32 = K_batched.astype(jnp.float32)
    inv_K = _inv_3x3(K_f32)                       # (B, 3, 3) glue
    B = int(K_f32.shape[0])
    H, W = int(height), int(width)

    xy1_grid, uv_grid_base = cam_grid_pallas(inv_K, H, W, xy1_dtype=xy1_dtype)

    # Reference-compatible uvb_grid = (u, v, batch_index).  u/v come from the
    # shared un-batched base written once by the kernel; the batched tensor is
    # assembled here with a cheap XLA broadcast purely to preserve the reference
    # (B, 3, H, W) layout.  Performance-sensitive consumers should use
    # `uv_grid_base` (plus jnp.arange(B)) and skip this materialization.
    batch_plane = jnp.broadcast_to(
        jnp.arange(B, dtype=jnp.float32)[:, None, None, None], (B, 1, H, W))
    uvb_grid = jnp.concatenate(
        [jnp.broadcast_to(uv_grid_base[None], (B, 2, H, W)), batch_plane], axis=1)

    if P_cam_li_batched is None:
        # Matches the torch reference: the .repeat() result is never assigned,
        # so P_cam_li stays a single (4, 4) identity.
        P_cam_li_batched = jnp.eye(4, dtype=jnp.float32)

    return dict(K=K_f32,
                width=W, height=H,
                xy1_grid=xy1_grid, uvb_grid=uvb_grid,
                uv_grid_base=uv_grid_base,
                P_cam_li=P_cam_li_batched.astype(jnp.float32))


class CamProjPallas:
    """Pallas-backed CamProj. forward() is a no-op (as in the reference)."""

    def __init__(self, intr_dict=None, batch_size=None):
        self.batch_size = batch_size
        self.cam_infos = {}
        if intr_dict is not None:
            for key, (width, height, K) in intr_dict.items():
                K_batched = jnp.broadcast_to(K[None], (batch_size,) + K.shape)
                self.cam_infos[key] = cam_info_from_K_batched(
                    width, height, K_batched, None)

    def prepare_cam_info(self, key=None, xy_crop=None, intr=None):
        # TODO(synk): xy_crop (per-batch dynamic crop of grids/K) is data-
        # dependent host-side slicing glue, not a kernel hot path; omitted.
        if key is not None:
            return self.cam_infos[key]
        assert intr is not None
        width, height, K = intr
        K_batched = jnp.broadcast_to(K[None], (self.batch_size,) + K.shape)
        return cam_info_from_K_batched(width, height, K_batched, None)

    def forward(self):
        pass


if __name__ == "__main__":
    root_key = jax.random.PRNGKey(0)

    def make_K(B, H, W, key):
        k_f, k_c = jax.random.split(key)
        f = 50.0 + 50.0 * jax.random.uniform(k_f, (B, 2), dtype=jnp.float32)
        c = 0.25 + 0.5 * jax.random.uniform(k_c, (B, 2), dtype=jnp.float32)
        K = jnp.zeros((B, 3, 3), jnp.float32)
        K = K.at[:, 0, 0].set(f[:, 0])
        K = K.at[:, 1, 1].set(f[:, 1])
        K = K.at[:, 0, 2].set(c[:, 0] * W)
        K = K.at[:, 1, 2].set(c[:, 1] * H)
        K = K.at[:, 2, 2].set(1.0)
        return K

    def reference(K, H, W):
        B = K.shape[0]
        uv1 = gen_uv1_grid(W, H).reshape(3, H * W)
        inv_K_ref = jnp.linalg.inv(K)
        xy1_ref = jnp.einsum("bij,jn->bin", inv_K_ref, uv1).reshape(B, 3, H, W)
        uv_ref = uv1.reshape(3, H, W)[:2]
        return xy1_ref, uv_ref

    # (B, H, W, forced_row_tile):
    #   flat pow2-W path | ragged last tile | W%128==0 dense path | non-pow2 W
    cases = [(2, 16, 16, None), (3, 20, 16, 16), (2, 16, 128, None), (2, 48, 24, None)]
    for idx, (B, H, W, rt) in enumerate(cases):
        K = make_K(B, H, W, jax.random.fold_in(root_key, idx))
        xy1, uv = cam_grid_pallas(_inv_3x3(K), H, W, row_tile=rt)
        jax.block_until_ready(xy1)
        jax.block_until_ready(uv)
        xy1_ref, uv_ref = reference(K, H, W)
        assert xy1.shape == (B, 3, H, W) and uv.shape == (2, H, W), (B, H, W)
        assert np.allclose(np.asarray(xy1), np.asarray(xy1_ref),
                           rtol=1e-4, atol=1e-5), ("xy1 mismatch", B, H, W)
        assert np.allclose(np.asarray(uv), np.asarray(uv_ref),
                           rtol=0.0, atol=1e-6), ("uv mismatch", B, H, W)

    # Full cam_info path (reference semantics: batched uvb with batch-index
    # plane) + the CamProj-style class wrapper.
    B, H, W = 2, 16, 16
    K_batched = make_K(B, H, W, root_key)
    cam_info = cam_info_from_K_batched(W, H, K_batched, None)
    jax.block_until_ready(cam_info["xy1_grid"])
    jax.block_until_ready(cam_info["uvb_grid"])

    xy1_ref, uv_ref = reference(K_batched, H, W)
    uvb_ref = jnp.concatenate(
        [jnp.broadcast_to(uv_ref[None], (B, 2, H, W)),
         jnp.broadcast_to(jnp.arange(B, dtype=jnp.float32)[:, None, None, None],
                          (B, 1, H, W))], axis=1)

    assert cam_info["xy1_grid"].shape == (B, 3, H, W)
    assert cam_info["uvb_grid"].shape == (B, 3, H, W)
    assert cam_info["uv_grid_base"].shape == (2, H, W)
    assert cam_info["P_cam_li"].shape == (4, 4)
    assert np.allclose(np.asarray(cam_info["xy1_grid"]), np.asarray(xy1_ref),
                       rtol=1e-4, atol=1e-5)
    assert np.allclose(np.asarray(cam_info["uvb_grid"]), np.asarray(uvb_ref),
                       rtol=0.0, atol=1e-6)

    proj = CamProjPallas(intr_dict={"cam0": (W, H, K_batched[0])}, batch_size=B)
    info0 = proj.prepare_cam_info("cam0")
    assert info0["uvb_grid"].shape == (B, 3, H, W)
    proj.forward()   # no-op, as in the reference

    print("KERNEL_OK")
</pallas_src>

<mosaic_0001>
module attributes {stable_mosaic.version = 11 : i64} {
  func.func @_cam_grid_kernel(%arg0: i32, %arg1: i32, %arg2: memref<18xf32, #tpu.memory_space<smem>>, %arg3: memref<1x3x128xf32, #tpu.memory_space<vmem>>, %arg4: memref<2x128xf32, #tpu.memory_space<vmem>>) attributes {dimension_semantics = [#tpu.dimension_semantics<parallel>, #tpu.dimension_semantics<arbitrary>], iteration_bounds = array<i64: 2, 2>, scalar_prefetch = 0 : i64, scratch_operands = 0 : i64, tpu.core_type = #tpu.core_type<tc>, window_params = [{transform_indices = @transform_0, window_bounds = array<i64: 18>}, {transform_indices = @transform_1, window_bounds = array<i64: 1, 3, 128>}, {transform_indices = @transform_2, window_bounds = array<i64: 2, 128>}]} {
    %c8_i32 = arith.constant 8 : i32
    %0 = arith.muli %arg0, %c8_i32 : i32
    %1 = arith.sitofp %0 : i32 to f32
    %2 = tpu.iota {dimensions = array<i32: 1>} : vector<1x128xi32>
    %c15_i32 = arith.constant 15 : i32
    %3 = vector.broadcast %c15_i32 : i32 to vector<1x128xi32>
    %4 = arith.andi %2, %3 : vector<1x128xi32>
    %5 = arith.sitofp %4 : vector<1x128xi32> to vector<1x128xf32>
    %c4_i32 = arith.constant 4 : i32
    %6 = vector.broadcast %c4_i32 : i32 to vector<1x128xi32>
    %7 = arith.shrsi %2, %6 : vector<1x128xi32>
    %8 = arith.sitofp %7 : vector<1x128xi32> to vector<1x128xf32>
    %9 = vector.broadcast %1 : f32 to vector<1x128xf32>
    %10 = arith.addf %8, %9 : vector<1x128xf32>
    %c9_i32 = arith.constant 9 : i32
    %11 = arith.muli %arg1, %c9_i32 : i32
    %c0_i32 = arith.constant 0 : i32
    %12 = arith.addi %11, %c0_i32 : i32
    %13 = arith.index_cast %12 : i32 to index
    %14 = memref.load %arg2[%13] : memref<18xf32, #tpu.memory_space<smem>>
    %c1_i32 = arith.constant 1 : i32
    %15 = arith.addi %11, %c1_i32 : i32
    %16 = arith.index_cast %15 : i32 to index
    %17 = memref.load %arg2[%16] : memref<18xf32, #tpu.memory_space<smem>>
    %c2_i32 = arith.constant 2 : i32
    %18 = arith.addi %11, %c2_i32 : i32
    %19 = arith.index_cast %18 : i32 to index
    %20 = memref.load %arg2[%19] : memref<18xf32, #tpu.memory_space<smem>>
    %c3_i32 = arith.constant 3 : i32
    %21 = arith.addi %11, %c3_i32 : i32
    %22 = arith.index_cast %21 : i32 to index
    %23 = memref.load %arg2[%22] : memref<18xf32, #tpu.memory_space<smem>>
    %c4_i32_0 = arith.constant 4 : i32
    %24 = arith.addi %11, %c4_i32_0 : i32
    %25 = arith.index_cast %24 : i32 to index
    %26 = memref.load %arg2[%25] : memref<18xf32, #tpu.memory_space<smem>>
    %c5_i32 = arith.constant 5 : i32
    %27 = arith.addi %11, %c5_i32 : i32
    %28 = arith.index_cast %27 : i32 to index
    %29 = memref.load %arg2[%28] : memref<18xf32, #tpu.memory_space<smem>>
    %c6_i32 = arith.constant 6 : i32
    %30 = arith.addi %11, %c6_i32 : i32
    %31 = arith.index_cast %30 : i32 to index
    %32 = memref.load %arg2[%31] : memref<18xf32, #tpu.memory_space<smem>>
    %c7_i32 = arith.constant 7 : i32
    %33 = arith.addi %11, %c7_i32 : i32
    %34 = arith.index_cast %33 : i32 to index
    %35 = memref.load %arg2[%34] : memref<18xf32, #tpu.memory_space<smem>>
    %c8_i32_1 = arith.constant 8 : i32
    %36 = arith.addi %11, %c8_i32_1 : i32
    %37 = arith.index_cast %36 : i32 to index
    %38 = memref.load %arg2[%37] : memref<18xf32, #tpu.memory_space<smem>>
    %39 = vector.broadcast %14 : f32 to vector<1x128xf32>
    %40 = arith.mulf %39, %5 : vector<1x128xf32>
    %41 = vector.broadcast %17 : f32 to vector<1x128xf32>
    %42 = arith.mulf %41, %10 : vector<1x128xf32>
    %43 = arith.addf %40, %42 : vector<1x128xf32>
    %44 = vector.broadcast %20 : f32 to vector<1x128xf32>
    %45 = arith.addf %43, %44 : vector<1x128xf32>
    %46 = vector.broadcast %23 : f32 to vector<1x128xf32>
    %47 = arith.mulf %46, %5 : vector<1x128xf32>
    %48 = vector.broadcast %26 : f32 to vector<1x128xf32>
    %49 = arith.mulf %48, %10 : vector<1x128xf32>
    %50 = arith.addf %47, %49 : vector<1x128xf32>
    %51 = vector.broadcast %29 : f32 to vector<1x128xf32>
    %52 = arith.addf %50, %51 : vector<1x128xf32>
    %53 = vector.broadcast %32 : f32 to vector<1x128xf32>
    %54 = arith.mulf %53, %5 : vector<1x128xf32>
    %55 = vector.broadcast %35 : f32 to vector<1x128xf32>
    %56 = arith.mulf %55, %10 : vector<1x128xf32>
    %57 = arith.addf %54, %56 : vector<1x128xf32>
    %58 = vector.broadcast %38 : f32 to vector<1x128xf32>
    %59 = arith.addf %57, %58 : vector<1x128xf32>
    %c0 = arith.constant 0 : index
    %c0_2 = arith.constant 0 : index
    %c0_3 = arith.constant 0 : index
    %60 = vector.load %arg3[%c0, %c0_2, %c0_3] : memref<1x3x128xf32, #tpu.memory_space<vmem>>, vector<1x1x128xf32>
    %61 = vector.shape_cast %60 : vector<1x1x128xf32> to vector<1x128xf32>
    %62 = vector.shape_cast %45 : vector<1x128xf32> to vector<1x1x128xf32>
    tpu.vector_store %arg3[%c0, %c0_2, %c0_3], %62 {strides = array<i32>} : memref<1x3x128xf32, #tpu.memory_space<vmem>>, vector<1x1x128xf32>,
    %c0_4 = arith.constant 0 : index
    %c1 = arith.constant 1 : index
    %c0_5 = arith.constant 0 : index
    %63 = vector.load %arg3[%c0_4, %c1, %c0_5] : memref<1x3x128xf32, #tpu.memory_space<vmem>>, vector<1x1x128xf32>
    %64 = vector.shape_cast %63 : vector<1x1x128xf32> to vector<1x128xf32>
    %65 = vector.shape_cast %52 : vector<1x128xf32> to vector<1x1x128xf32>
    tpu.vector_store %arg3[%c0_4, %c1, %c0_5], %65 {strides = array<i32>} : memref<1x3x128xf32, #tpu.memory_space<vmem>>, vector<1x1x128xf32>,
    %c0_6 = arith.constant 0 : index
    %c2 = arith.constant 2 : index
    %c0_7 = arith.constant 0 : index
    %66 = vector.load %arg3[%c0_6, %c2, %c0_7] : memref<1x3x128xf32, #tpu.memory_space<vmem>>, vector<1x1x128xf32>
    %67 = vector.shape_cast %66 : vector<1x1x128xf32> to vector<1x128xf32>
    %68 = vector.shape_cast %59 : vector<1x128xf32> to vector<1x1x128xf32>
    tpu.vector_store %arg3[%c0_6, %c2, %c0_7], %68 {strides = array<i32>} : memref<1x3x128xf32, #tpu.memory_space<vmem>>, vector<1x1x128xf32>,
    %c0_i32_8 = arith.constant 0 : i32
    %69 = arith.cmpi eq, %arg1, %c0_i32_8 : i32
    %70 = arith.extui %69 : i1 to i32
    %c0_i32_9 = arith.constant 0 : i32
    %71 = arith.cmpi ne, %70, %c0_i32_9 : i32
    scf.if %71 {
      %c0_10 = arith.constant 0 : index
      %c0_11 = arith.constant 0 : index
      %72 = vector.load %arg4[%c0_10, %c0_11] : memref<2x128xf32, #tpu.memory_space<vmem>>, vector<1x128xf32>
      tpu.vector_store %arg4[%c0_10, %c0_11], %5 {strides = array<i32>} : memref<2x128xf32, #tpu.memory_space<vmem>>, vector<1x128xf32>,
      %c1_12 = arith.constant 1 : index
      %c0_13 = arith.constant 0 : index
      %73 = vector.load %arg4[%c1_12, %c0_13] : memref<2x128xf32, #tpu.memory_space<vmem>>, vector<1x128xf32>
      tpu.vector_store %arg4[%c1_12, %c0_13], %10 {strides = array<i32>} : memref<2x128xf32, #tpu.memory_space<vmem>>, vector<1x128xf32>,
    } else {
    }
    return
  }
  func.func @transform_0(%arg0: i32, %arg1: i32) -> i32 {
    %c0_i32 = arith.constant 0 : i32
    %c0_i32_0 = arith.constant 0 : i32
    return %c0_i32 : i32
  }
  func.func @transform_1(%arg0: i32, %arg1: i32) -> (i32, i32, i32) {
    %c0_i32 = arith.constant 0 : i32
    %c0_i32_0 = arith.constant 0 : i32
    return %arg1, %c0_i32, %arg0 : i32, i32, i32
  }
  func.func @transform_2(%arg0: i32, %arg1: i32) -> (i32, i32) {
    %c0_i32 = arith.constant 0 : i32
    %c0_i32_0 = arith.constant 0 : i32
    return %c0_i32, %arg0 : i32, i32
  }
}

</mosaic_0001>

<bundles_post_ra>
// kernel: tpu_custom_call.1
= control target key start
LH: loop header
LB: loop body
LE: loop exit
PB: predicated region body
PF: predicated region fallthrough
CT: control target
= control target key end

     0   :  { %s754_s0 = inlined_call_operand.hbm [shape: f32[18], index: 0, kind: input, shape index: {}]   ;;  %s755_s1 = inlined_call_operand.vmem [shape: f32[2,3,256], index: 1, kind: output, shape index: {0}]   ;;  %s756_s2 = inlined_call_operand.hbm [shape: f32[2,256], index: 2, kind: output, shape index: {1}]  }
   0x1   :  { %761 = sst [smem:[#allocation12_spill]] %s754_s0 }
   0x2   :  { %8 = vsyncpa [#allocation4], 0 }
   0x3   :  { %9 = vsyncpa [#allocation3], 0 }
   0x4   :  { %11 = vsyncpa [#allocation3 + $0x1], 0  ;;  %s583_s9 = smov 0   ;;  %s585_s10 = smov 0  }
   0x5   :  { %s587_s11 = smov 0   ;;  %s589_s12 = smov 0  }
   0x6   :  { %s591_s13 = smov 0   ;;  %s593_s14 = smov 0  }
   0x7   :  { %s595_s15 = smov 0   ;;  %s597_s16 = smov 0  }
   0x8 LB: > { %762 = sst [smem:[#allocation8_spill]] %s556_s14  ;;  %s356_s17 = sadd.s32 4294967295, %s564_s16   ;;  %s564_s16 = sphi %s597_s16, %s17_s16   ;;  %s560_s15 = sphi %s595_s15, %s775_s15   ;;  %s556_s14 = sphi %s593_s14, %s774_s14   ;;  %s552_s13 = sphi %s591_s13, %s773_s13   ;;  %s548_s12 = sphi %s589_s12, %s772_s12   ;;  %s544_s11 = sphi %s587_s11, %s778_s11   ;;  %s540_s10 = sphi %s585_s10, %s777_s10   ;;  %s536_s9 = sphi %s583_s9, %s776_s9  }
   0x9   : > { %763 = sst [smem:[#allocation9_spill]] %s560_s15  ;;  %s357_s18 = sadd.s32 4294967294, %s564_s16  }
   0xa   : > { %s26_s19 = sadd.s32 1, %s556_s14  ;;  %s29_s20 = sadd.s32 1, %s560_s15 }
   0xb   : > { %p27_p0 = scmp.ge.s32.totalorder %s26_s19, 2  ;;  %s85_s21 = sadd.s32 1, %s544_s11 }
   0xc   : > { %p95_p1 = scmp.ne.s32.totalorder %s544_s11, %s540_s10  ;;  %p96_p2 = scmp.eq.s32.totalorder %s356_s17, 3 }
   0xd   : > { %s780_s19 = smov (%p27_p0, %s26_s19), 0  ;;  %s782_s20 = smov (!%p27_p0, %s29_s20), %s560_s15 }
   0xe   : > { %764 = sst [smem:[#allocation10_spill]] %s780_s19  ;;  %p633_p3 = por %p96_p2, %p95_p1 }
   0xf   : > { %p101_p4 = scmp.ne.s32.totalorder %s540_s10, %s536_s9  ;;  %p31_p5 = scmp.ge.s32.totalorder %s782_s20, 2 }
  0x10   : > { %p102_p6 = scmp.eq.s32.totalorder %s357_s18, 3  ;;  %p358_p7 = scmp.ge.s32.totalorder %s564_s16, 1 }
  0x11   : > { %p109_p8 = scmp.lt.s32.totalorder %s564_s16, 5  ;;  %s784_s20 = smov (%p31_p5, %s782_s20), 0 }
  0x12   : > { %766 = sst [smem:[#allocation11_spill]] %s784_s20  ;;  %p643_p9 = por %p102_p6, %p101_p4 }
  0x13   : > { %p647_p10 = pnand %p358_p7, %p109_p8  ;;  %s82_s25 = ssub.s32 %s560_s15, %s784_s20 }
  0x14   : > { %p83_p11 = scmp.eq.s32.totalorder %s82_s25, 0  ;;  %p655_p13 = scmp.eq.s32.totalorder %s356_s17, 0 }
  0x15   : > { %p377_p12 = pneg %p647_p10  ;;  %s770_s0 = sld [smem:[#allocation12_spill]] }
  0x16   : > { %s660_s27 = scalar_select %p83_p11, %s544_s11, %s85_s21  }
  0x17   : > { %p378_p0 = pnand %p655_p13, %p377_p12 }
  0x19   : > { %p455_p2 = pneg %p378_p0 }
  0x1b   : > { %s453_s30 = scalar_lea.hbm %s770_s0, 16 }
  0x1c   : > { %p454_p1 = scmp.ne.s32.totalorder %s770_s0, %s453_s30  ;;  %p460_p6 = scmp.lt.u32.totalorder %s453_s30, %s770_s0 }
  0x1e   : > { %p456_p4 = pnand %p455_p2, %p454_p1 }
  0x20   : > { %p457_p5 = pneg %p456_p4 }
  0x22   : > { %p462_p7 = pnand %p460_p6, %p457_p5 }
  0x24   : > { %465 = shalt.err (!%p462_p7)
}
  0x25   : > { %s566_s7 = smov [#allocation2]   ;;  %133 = sbr.rel (%p647_p10) target bundleno = 100 (0x64), region = 24 }
  0x26   : > { %380 = dma.hbm_to_smem (!%p378_p0), %s770_s0, 16, %s566_s7, [#allocation4]  }
  0x2c   : > { %527 = dma.done.wait (%p655_p13), [#allocation4], 16  }
  0x2d   : > { %529 = vsyncadd (%p655_p13), [#allocation4], 4294967280 }
  0x2e   : > { %139 = sfence }
  0x2f   : > { %s757_s18 = sand.u32 1, %s540_s10   ;;  %p159_p8 = scmp.lt.s32.totalorder %s548_s12, 1  ;;  %v169_v0 = vlaneseq }
  0x30   : > { %s686_s21 = sshll.u32 %s757_s18, 1  ;;  %p161_p10 = scmp.lt.s32.totalorder %s552_s13, 1 }
  0x31   : > { %s365_s24 = sshll.u32 %s552_s13, 3  ;;  %v170_v1 = vand.u32 127, %v169_v0  ;;  %s177_s30 = smul.u32 9, %s548_s12 }
  0x32   : > { %s160_s25 = scalar_select %p159_p8, %s548_s12, 1 }
  0x33   : > { %s162_s26 = scalar_select %p161_p10, %s552_s13, 1  ;;  %v173_v2 = vshra.s32 %v170_v1, 4  ;;  %v171_v3 = vand.u32 15, %v170_v1 }
  0x34   : > { %s363_s28 = sshll.u32 %s160_s25, 1  ;;  %s168_s29 = scvt.s32.f32 %s365_s24 }
  0x35   : > { %s693_s3 = sadd.s32 %s363_s28, %s162_s26  ;;  %s178_s4 = sld [smem:[#allocation2 + %s177_s30]]  ;;  %v174_v4 = vcvt.s32.f32 %v173_v2  ;;  %v172_v6 = vcvt.s32.f32 %v171_v3 }
  0x36   : > { %s179_s5 = sadd.s32 1, %s177_s30  ;;  %s181_s6 = sadd.s32 2, %s177_s30  ;;  %v175_v5 = vstv %s168_s29 }
  0x37   : > { %s180_s7 = sld [smem:[#allocation2 + %s179_s5]]  ;;  %s183_s17 = sadd.s32 3, %s177_s30  ;;  %v176_v7 = vadd.f32 %v175_v5, %v174_v4 }
  0x38   : > { %s182_s8 = sld [smem:[#allocation2 + %s181_s6]]  ;;  %s185_s18 = sadd.s32 4, %s177_s30 }
  0x39   : > { %s184_s0 = sld [smem:[#allocation2 + %s183_s17]]  ;;  %s187_s25 = sadd.s32 5, %s177_s30 }
  0x3a   : > { %s186_s20 = sld [smem:[#allocation2 + %s185_s18]]  ;;  %s189_s24 = sadd.s32 6, %s177_s30 }
  0x3b   : > { %v195_v8 = vstv %s178_s4  ;;  %s188_s19 = sld [smem:[#allocation2 + %s187_s25]]  ;;  %s191_s28 = sadd.s32 7, %s177_s30 }
  0x3c   : > { %s190_s26 = sld [smem:[#allocation2 + %s189_s24]]  ;;  %v196_v9 = vmul.f32 %v195_v8, %v172_v6  ;;  %s193_s15 = sadd.s32 8, %s177_s30 }
  0x3d   : > { %v197_v10 = vstv %s180_s7  ;;  %s192_s14 = sld [smem:[#allocation2 + %s191_s28]]  ;;  %s364_s5 = sshll.u32 %s693_s3, 2 }
  0x3e   : > { %s194_s29 = sld [smem:[#allocation2 + %s193_s15]]  ;;  %v198_v11 = vmul.f32 %v197_v10, %v176_v7  ;;  %v200_v12 = vstv %s182_s8  ;;  %s166_s4 = scalar_lea.vmem %s755_s1, %s364_s5 }
  0x3f   : > { %v202_v13 = vstv %s184_s0  ;;  %s158_s0 = scalar_lea.vmem [#allocation5], %s686_s21  ;;  %p366_p11 = scmp.ne.s32.totalorder %s548_s12, 0 }
  0x40   : > { %v204_v14 = vstv %s186_s20  ;;  %v199_v15 = vadd.f32 %v198_v11, %v196_v9  ;;  %v203_v16 = vmul.f32 %v202_v13, %v172_v6  ;;  %223 = vst [vmem:[%s158_s0] sm:$0x1] (!%p366_p11), %v172_v6  ;;  %224 = vst [vmem:[%s158_s0 + $0x1] sm:$0x1] (!%p366_p11), %v176_v7 }
  0x41   : > { %v205_v17 = vmul.f32 %v204_v14, %v176_v7  ;;  %v207_v18 = vstv %s188_s19 }
  0x42   : > { %v209_v19 = vstv %s190_s26  ;;  %v201_v20 = vadd.f32 %v200_v12, %v199_v15 }
  0x43   : > { %v206_v21 = vadd.f32 %v205_v17, %v203_v16  ;;  %v210_v22 = vmul.f32 %v209_v19, %v172_v6  ;;  %v211_v23 = vstv %s192_s14 }
  0x44   : > { %216 = vst [vmem:[%s166_s4] sm:$0x1] %v201_v20  ;;  %v212_v25 = vmul.f32 %v211_v23, %v176_v7  ;;  %v214_v26 = vstv %s194_s29  ;;  %222 = sbr.rel (%p366_p11) target bundleno = 75 (0x4b), region = 32 }
  0x45   : > { %v208_v24 = vadd.f32 %v207_v18, %v206_v21 }
  0x46   : > { %v213_v27 = vadd.f32 %v212_v25, %v210_v22 }
  0x47   : > { %217 = vst [vmem:[%s166_s4 + $0x1] sm:$0x1] %v208_v24 }
  0x48   : > { %v215_v28 = vadd.f32 %v214_v26, %v213_v27 }
  0x4a   : > { %218 = vst [vmem:[%s166_s4 + $0x2] sm:$0x1] %v215_v28 }
  0x4b PF: > { %s368_s15 = sshll.u32 %s552_s13, 5  ;;  %s250_s30 = sshll.u32 %s158_s0, 4  ;;  %s251_s30 = int_to_ptr.vmem [resolvable:$true] %s250_s30 }
  0x4c   : > { %s705_s20 = scalar_lea.hbm %s756_s2, %s368_s15  ;;  %s771_s3 = sand.u32 1, %s540_s10  }
  0x4d   : > { %s234_s7 = scalar_lea.sflag [#allocation3], %s771_s3  ;;  %s466_s21 = scalar_lea.vmem %s251_s30, 32 }
  0x4e   : > { %p467_p12 = scmp.ne.s32.totalorder %s251_s30, %s466_s21  ;;  %s567_s12 = smov [#allocation5]  }
  0x4f   : > { %s470_s8 = sshll.u32 %s567_s12, 4  ;;  %s471_s8 = int_to_ptr.vmem [resolvable:$false] %s470_s8 }
  0x50   : > { %p468_p13 = pnand %p467_p12, %p633_p3  ;;  %s472_s17 = scalar_lea.vmem %s471_s8, 64 }
  0x51   : > { %p473_p1 = scmp.lt.s32.totalorder %s251_s30, %s471_s8  ;;  %p474_p2 = scmp.lt.s32.totalorder %s472_s17, %s466_s21 }
  0x52   : > { %p469_p0 = pneg %p468_p13 }
  0x53   : > { %p475_p4 = por %p474_p2, %p473_p1 }
  0x55   : > { %p476_p5 = pnand %p475_p4, %p469_p0 }
  0x57   : > { %479 = shalt.err (!%p476_p5)
}
  0x58   : > { %s480_s13 = scalar_lea.hbm %s705_s20, 32  ;;  %s484_s26 = scalar_lea.hbm %s756_s2, 64 }
  0x59   : > { %p481_p6 = scmp.ne.s32.totalorder %s705_s20, %s480_s13  ;;  %p485_p10 = scmp.lt.u32.totalorder %s705_s20, %s756_s2 }
  0x5a   : > { %p486_p11 = scmp.lt.u32.totalorder %s484_s26, %s480_s13  ;;  %p488_p13 = scmp.lt.u32.totalorder %s480_s13, %s705_s20 }
  0x5b   : > { %p482_p7 = pnand %p481_p6, %p633_p3 }
  0x5c   : > { %p487_p12 = por %p486_p11, %p485_p10 }
  0x5d   : > { %p483_p8 = pneg %p482_p7 }
  0x5e   : > { %p489_p0 = por %p488_p13, %p487_p12 }
  0x60   : > { %p490_p1 = pnand %p489_p0, %p483_p8 }
  0x62   : > { %493 = shalt.err (!%p490_p1)
}
  0x63   : > { %375 = dma.vmem_to_hbm [thread:$0]  (%p633_p3), %s251_s30, 32, %s705_s20, %s234_s7  }
  0x64 PF: > { %p387_p2 = scmp.ge.s32.totalorder %s564_s16, 2  ;;  %s273_s5 = sand.u32 1, %s536_s9  }
  0x65   : > { %s274_s18 = scalar_lea.sflag [#allocation3], %s273_s5 }
  0x66   : > { %p382_p4 = pnand %p387_p2, %p643_p9 }
  0x68   : > { %531 = dma.done.wait (!%p382_p4), %s274_s18, 32  }
  0x69   : > { %533 = vsyncadd (!%p382_p4), %s274_s18, 4294967264  ;;  %s17_s16 = sadd.s32 1, %s564_s16   ;;  %s772_s12 = sld [smem:[#allocation8_spill]] }
  0x6a   : > { %p14_p5 = scmp.ge.s32.totalorder %s17_s16, 6   ;;  %s773_s13 = sld [smem:[#allocation9_spill]] }
  0x6b   : > { %s774_s14 = sld [smem:[#allocation10_spill]]  ;;  %s775_s15 = sld [smem:[#allocation11_spill]] }
  0x6c   : > { %s776_s9 = smov %s540_s10  ;;  %s777_s10 = smov %s544_s11 }
  0x6d   : > { %s778_s11 = smov %s660_s27  ;;  %16 = sbr.rel (!%p14_p5) target bundleno = 8 (0x8), region = 77 }
  0x74   :  { %279 = vsyncpa [#allocation3], 1 }
  0x75   :  { %281 = vsyncpa [#allocation3 + $0x1], 1 }
  0x76   :  { %282 = vsyncpa [#allocation4], 1 }
  0x77   :  { %284 = vsyncpa [#allocation4 + $0x1], 1 }

</bundles_post_ra>
